<compile_context>
chip_gen: v7x
topology: tpu7x:2x2x1
jax: 0.10.0
libtpu: 0.0.40
codegen_flags: <defaults>
</compile_context>

<pallas_src>
from functools import partial

import jax
import jax.numpy as jnp
from jax.experimental import pallas as pl
from jax.experimental.pallas import tpu as pltpu


def last_layer_kernel(vec_ref, x_ref, w_ref, b_ref, o_ref):
    # vec_ref: (2, B, H)      [shift, scale], resident
    # x_ref:   (B, tile_t, H) streamed row tile
    # w_ref:   (H, O)         resident (bf16 for native MXU)
    # b_ref:   (1, O)         resident (f32, added after f32 accumulation)
    # o_ref:   (B, tile_t, O)
    B, tt, H = x_ref.shape

    w = w_ref[...]                                   # (H, O)
    bias = b_ref[...].astype(jnp.float32)            # (1, O)
    shift_all = vec_ref[0].astype(jnp.float32)       # (B, H)
    scale_all = vec_ref[1].astype(jnp.float32)       # (B, H)
    inv_h = jnp.float32(1.0 / H)

    # Static unroll over the (small) batch dim; per-batch shift/scale are
    # (1, H) rows -> plain sublane broadcast against the (tile_t, H) tile.
    for bi in range(B):
        x = x_ref[bi].astype(jnp.float32)            # (tile_t, H), f32 math

        # --- LayerNorm (eps=1e-6, no affine), two-pass, f32 -----------------
        mean = jnp.sum(x, axis=-1, keepdims=True) * inv_h
        xc = x - mean
        var = jnp.sum(xc * xc, axis=-1, keepdims=True) * inv_h
        ln = xc * jax.lax.rsqrt(var + jnp.float32(1e-6))

        # --- modulation: addcmul(shift, 1 + scale, ln) -----------------------
        shift = shift_all[bi:bi + 1]                 # (1, H)
        scale = scale_all[bi:bi + 1]                 # (1, H)
        mod = shift + (1.0 + scale) * ln             # (tile_t, H), f32

        # --- Linear: cast to weight dtype only at the dot, f32 accumulation --
        y = jnp.dot(mod.astype(w.dtype), w, preferred_element_type=jnp.float32)
        o_ref[bi] = (y + bias).astype(o_ref.dtype)   # (tile_t, O)


def prepare_last_layer_params(weight, bias, *, mxu_dtype=jnp.bfloat16):
    """One-time parameter prep (call once, outside the hot path).

    weight: (O, H) PyTorch Linear layout -> returns (H, O) in `mxu_dtype`.
    bias:   (O,)  -> (1, O) f32 (added after the f32 MXU accumulation).
    """
    w_t = jnp.asarray(weight).T.astype(mxu_dtype)          # (H, O)
    b2 = jnp.asarray(bias).astype(jnp.float32).reshape(1, -1)  # (1, O)
    return w_t, b2


@partial(jax.jit, static_argnames=("tile_t",))
def last_layer(x, vec, w_t, b2, *, tile_t=256):
    """x: (B, T, H); vec: (2, B, 1, H); w_t: (H, O) prepped; b2: (1, O) -> (B, T, O)."""
    B, T, H = x.shape
    O = w_t.shape[1]
    tt = min(tile_t, T)
    # TODO(synk): if T % tile_t != 0, the last (padded) row block relies on
    # Pallas OOB-store masking (garbage rows are computed but never written).
    grid = (pl.cdiv(T, tt),)

    # Drop the size-1 sublane dim of vec (contiguous -> free reshape).
    vec2 = vec.reshape(2, B, H)

    # VMEM budget: double-buffered x/out row tiles + resident vec/W/bias
    # (+ headroom). Capped at 48 MiB so the same kernel fits v7x (64 MiB phys).
    need = (2 * B * tt * (H + O) * x.dtype.itemsize
            + 2 * (2 * B * H * vec.dtype.itemsize
                   + H * O * w_t.dtype.itemsize
                   + O * b2.dtype.itemsize)
            + (2 << 20))
    vmem_limit = int(min(max(need, 8 << 20), 48 << 20))

    # TODO(synk): for production T (thousands of rows), pad O to a multiple of
    # 128 once at param-prep time and keep the padded output flowing into
    # unpatchify so the output store is an unmasked, lane-dense vst.
    return pl.pallas_call(
        last_layer_kernel,
        out_shape=jax.ShapeDtypeStruct((B, T, O), x.dtype),
        grid=grid,
        in_specs=[
            pl.BlockSpec((2, B, H), lambda t: (0, 0, 0)),    # vec  — resident
            pl.BlockSpec((B, tt, H), lambda t: (0, t, 0)),   # x    — streamed
            pl.BlockSpec((H, O), lambda t: (0, 0)),          # W    — resident
            pl.BlockSpec((1, O), lambda t: (0, 0)),          # bias — resident
        ],
        out_specs=pl.BlockSpec((B, tt, O), lambda t: (0, t, 0)),
        compiler_params=pltpu.CompilerParams(
            dimension_semantics=("parallel",),   # row tiles shard across v7x's 2 TCs
            vmem_limit_bytes=vmem_limit,
        ),
    )(vec2, x, w_t, b2)


def reference_matched(x, vec, w_t, b2):
    """Pure-JAX LastLayer.forward using the SAME prepared params (bf16 MXU
    operands, f32 accumulation) -> numerics match the kernel tightly."""
    shift = vec[0, :, 0, :][:, None, :]
    scale = vec[1, :, 0, :][:, None, :]
    mean = jnp.mean(x, axis=-1, keepdims=True)
    var = jnp.mean((x - mean) ** 2, axis=-1, keepdims=True)
    ln = (x - mean) / jnp.sqrt(var + 1e-6)
    mod = shift + (1.0 + scale) * ln
    y = jnp.einsum("bth,ho->bto", mod.astype(w_t.dtype), w_t,
                   preferred_element_type=jnp.float32)
    return (y + b2[0]).astype(x.dtype)


def reference_f32(x, vec, weight, bias):
    """Full-f32 mirror of the PyTorch module (semantic check, loose tol)."""
    shift = vec[0, :, 0, :][:, None, :]
    scale = vec[1, :, 0, :][:, None, :]
    mean = jnp.mean(x, axis=-1, keepdims=True)
    var = jnp.mean((x - mean) ** 2, axis=-1, keepdims=True)
    ln = (x - mean) / jnp.sqrt(var + 1e-6)
    mod = shift + (1.0 + scale) * ln
    return mod @ weight.T + bias


if __name__ == "__main__":
    # Module config: hidden_size=128, out_channels=64 (small demo shapes).
    B, T, H, O = 2, 8, 128, 64
    key = jax.random.PRNGKey(0)
    kx, kv, kw, kb = jax.random.split(key, 4)

    x = jax.random.normal(kx, (B, T, H), dtype=jnp.float32)
    vec = jax.random.normal(kv, (2, B, 1, H), dtype=jnp.float32)   # (shift, scale)
    weight = jax.random.normal(kw, (O, H), dtype=jnp.float32) * 0.02  # PyTorch layout
    bias = jax.random.normal(kb, (O,), dtype=jnp.float32) * 0.01

    # One-time parameter prep — hoisted out of the per-call path.
    w_t, b2 = prepare_last_layer_params(weight, bias)

    out = jax.block_until_ready(last_layer(x, vec, w_t, b2))

    assert out.shape == (B, T, O)
    ref_m = reference_matched(x, vec, w_t, b2)
    ref_e = reference_f32(x, vec, weight, bias)
    assert jnp.allclose(out, ref_m, atol=5e-3, rtol=5e-3), "mismatch vs matched-precision ref"
    assert jnp.allclose(out, ref_e, atol=5e-2, rtol=5e-2), "mismatch vs f32 reference"
    print("KERNEL_OK")
</pallas_src>

<mosaic_0001>
module attributes {stable_mosaic.version = 11 : i64} {
  func.func @last_layer_kernel(%arg0: i32, %arg1: memref<2x2x128xf32, #tpu.memory_space<vmem>>, %arg2: memref<2x8x128xf32, #tpu.memory_space<vmem>>, %arg3: memref<128x64xbf16, #tpu.memory_space<vmem>>, %arg4: memref<1x64xf32, #tpu.memory_space<vmem>>, %arg5: memref<2x8x64xf32, #tpu.memory_space<vmem>>) attributes {dimension_semantics = [#tpu.dimension_semantics<parallel>], iteration_bounds = array<i64: 1>, scalar_prefetch = 0 : i64, scratch_operands = 0 : i64, tpu.core_type = #tpu.core_type<tc>, window_params = [{pipeline_mode = #tpu.pipeline_mode<synchronous>, transform_indices = @transform_0, window_bounds = array<i64: 2, 2, 128>}, {transform_indices = @transform_1, window_bounds = array<i64: 2, 8, 128>}, {pipeline_mode = #tpu.pipeline_mode<synchronous>, transform_indices = @transform_2, window_bounds = array<i64: 128, 64>}, {pipeline_mode = #tpu.pipeline_mode<synchronous>, transform_indices = @transform_3, window_bounds = array<i64: 1, 64>}, {transform_indices = @transform_4, window_bounds = array<i64: 2, 8, 64>}]} {
    %c0 = arith.constant 0 : index
    %c0_0 = arith.constant 0 : index
    %0 = vector.load %arg3[%c0, %c0_0] : memref<128x64xbf16, #tpu.memory_space<vmem>>, vector<128x64xbf16>
    %c0_1 = arith.constant 0 : index
    %c0_2 = arith.constant 0 : index
    %1 = vector.load %arg4[%c0_1, %c0_2] : memref<1x64xf32, #tpu.memory_space<vmem>>, vector<1x64xf32>
    %c0_3 = arith.constant 0 : index
    %c0_4 = arith.constant 0 : index
    %c0_5 = arith.constant 0 : index
    %2 = vector.load %arg1[%c0_3, %c0_4, %c0_5] : memref<2x2x128xf32, #tpu.memory_space<vmem>>, vector<1x2x128xf32>
    %3 = vector.shape_cast %2 : vector<1x2x128xf32> to vector<2x128xf32>
    %c1 = arith.constant 1 : index
    %c0_6 = arith.constant 0 : index
    %c0_7 = arith.constant 0 : index
    %4 = vector.load %arg1[%c1, %c0_6, %c0_7] : memref<2x2x128xf32, #tpu.memory_space<vmem>>, vector<1x2x128xf32>
    %5 = vector.shape_cast %4 : vector<1x2x128xf32> to vector<2x128xf32>
    %c0_8 = arith.constant 0 : index
    %c0_9 = arith.constant 0 : index
    %c0_10 = arith.constant 0 : index
    %6 = vector.load %arg2[%c0_8, %c0_9, %c0_10] : memref<2x8x128xf32, #tpu.memory_space<vmem>>, vector<1x8x128xf32>
    %7 = vector.shape_cast %6 : vector<1x8x128xf32> to vector<8x128xf32>
    %cst = arith.constant dense<0.000000e+00> : vector<8xf32>
    %8 = vector.multi_reduction <add>, %7, %cst [1] : vector<8x128xf32> to vector<8xf32>
    %9 = vector.shape_cast %8 : vector<8xf32> to vector<8x1xf32>
    %cst_11 = arith.constant 7.812500e-03 : f32
    %10 = vector.broadcast %cst_11 : f32 to vector<8x1xf32>
    %11 = arith.mulf %9, %10 : vector<8x1xf32>
    %12 = vector.broadcast %11 : vector<8x1xf32> to vector<8x128xf32>
    %13 = arith.subf %7, %12 : vector<8x128xf32>
    %14 = arith.mulf %13, %13 : vector<8x128xf32>
    %cst_12 = arith.constant dense<0.000000e+00> : vector<8xf32>
    %15 = vector.multi_reduction <add>, %14, %cst_12 [1] : vector<8x128xf32> to vector<8xf32>
    %16 = vector.shape_cast %15 : vector<8xf32> to vector<8x1xf32>
    %cst_13 = arith.constant 7.812500e-03 : f32
    %17 = vector.broadcast %cst_13 : f32 to vector<8x1xf32>
    %18 = arith.mulf %16, %17 : vector<8x1xf32>
    %cst_14 = arith.constant 9.99999997E-7 : f32
    %19 = vector.broadcast %cst_14 : f32 to vector<8x1xf32>
    %20 = arith.addf %18, %19 : vector<8x1xf32>
    %21 = math.rsqrt %20 : vector<8x1xf32>
    %22 = vector.broadcast %21 : vector<8x1xf32> to vector<8x128xf32>
    %23 = arith.mulf %13, %22 : vector<8x128xf32>
    %24 = vector.extract_strided_slice %3 {offsets = [0, 0], sizes = [1, 128], strides = [1, 1]} : vector<2x128xf32> to vector<1x128xf32>
    %25 = vector.extract_strided_slice %5 {offsets = [0, 0], sizes = [1, 128], strides = [1, 1]} : vector<2x128xf32> to vector<1x128xf32>
    %cst_15 = arith.constant 1.000000e+00 : f32
    %26 = vector.broadcast %cst_15 : f32 to vector<1x128xf32>
    %27 = arith.addf %26, %25 : vector<1x128xf32>
    %28 = vector.broadcast %27 : vector<1x128xf32> to vector<8x128xf32>
    %29 = arith.mulf %28, %23 : vector<8x128xf32>
    %30 = vector.broadcast %24 : vector<1x128xf32> to vector<8x128xf32>
    %31 = arith.addf %30, %29 : vector<8x128xf32>
    %32 = arith.truncf %31 : vector<8x128xf32> to vector<8x128xbf16>
    %cst_16 = arith.constant dense<0.000000e+00> : vector<8x64xf32>
    %33 = tpu.matmul %32, %0, %cst_16 {dimension_numbers = #tpu.dot_dimension_numbers<[1], [0], [0], [1], [0, 0, 1, 1], [], []>} : vector<8x128xbf16>, vector<128x64xbf16>, vector<8x64xf32> -> vector<8x64xf32>
    %34 = vector.broadcast %1 : vector<1x64xf32> to vector<8x64xf32>
    %35 = arith.addf %33, %34 : vector<8x64xf32>
    %c0_17 = arith.constant 0 : index
    %c0_18 = arith.constant 0 : index
    %c0_19 = arith.constant 0 : index
    %36 = vector.load %arg5[%c0_17, %c0_18, %c0_19] : memref<2x8x64xf32, #tpu.memory_space<vmem>>, vector<1x8x64xf32>
    %37 = vector.shape_cast %36 : vector<1x8x64xf32> to vector<8x64xf32>
    %38 = vector.shape_cast %35 : vector<8x64xf32> to vector<1x8x64xf32>
    tpu.vector_store %arg5[%c0_17, %c0_18, %c0_19], %38 {strides = array<i32>} : memref<2x8x64xf32, #tpu.memory_space<vmem>>, vector<1x8x64xf32>,
    %c1_20 = arith.constant 1 : index
    %c0_21 = arith.constant 0 : index
    %c0_22 = arith.constant 0 : index
    %39 = vector.load %arg2[%c1_20, %c0_21, %c0_22] : memref<2x8x128xf32, #tpu.memory_space<vmem>>, vector<1x8x128xf32>
    %40 = vector.shape_cast %39 : vector<1x8x128xf32> to vector<8x128xf32>
    %cst_23 = arith.constant dense<0.000000e+00> : vector<8xf32>
    %41 = vector.multi_reduction <add>, %40, %cst_23 [1] : vector<8x128xf32> to vector<8xf32>
    %42 = vector.shape_cast %41 : vector<8xf32> to vector<8x1xf32>
    %cst_24 = arith.constant 7.812500e-03 : f32
    %43 = vector.broadcast %cst_24 : f32 to vector<8x1xf32>
    %44 = arith.mulf %42, %43 : vector<8x1xf32>
    %45 = vector.broadcast %44 : vector<8x1xf32> to vector<8x128xf32>
    %46 = arith.subf %40, %45 : vector<8x128xf32>
    %47 = arith.mulf %46, %46 : vector<8x128xf32>
    %cst_25 = arith.constant dense<0.000000e+00> : vector<8xf32>
    %48 = vector.multi_reduction <add>, %47, %cst_25 [1] : vector<8x128xf32> to vector<8xf32>
    %49 = vector.shape_cast %48 : vector<8xf32> to vector<8x1xf32>
    %cst_26 = arith.constant 7.812500e-03 : f32
    %50 = vector.broadcast %cst_26 : f32 to vector<8x1xf32>
    %51 = arith.mulf %49, %50 : vector<8x1xf32>
    %cst_27 = arith.constant 9.99999997E-7 : f32
    %52 = vector.broadcast %cst_27 : f32 to vector<8x1xf32>
    %53 = arith.addf %51, %52 : vector<8x1xf32>
    %54 = math.rsqrt %53 : vector<8x1xf32>
    %55 = vector.broadcast %54 : vector<8x1xf32> to vector<8x128xf32>
    %56 = arith.mulf %46, %55 : vector<8x128xf32>
    %57 = vector.extract_strided_slice %3 {offsets = [1, 0], sizes = [1, 128], strides = [1, 1]} : vector<2x128xf32> to vector<1x128xf32>
    %58 = vector.extract_strided_slice %5 {offsets = [1, 0], sizes = [1, 128], strides = [1, 1]} : vector<2x128xf32> to vector<1x128xf32>
    %cst_28 = arith.constant 1.000000e+00 : f32
    %59 = vector.broadcast %cst_28 : f32 to vector<1x128xf32>
    %60 = arith.addf %59, %58 : vector<1x128xf32>
    %61 = vector.broadcast %60 : vector<1x128xf32> to vector<8x128xf32>
    %62 = arith.mulf %61, %56 : vector<8x128xf32>
    %63 = vector.broadcast %57 : vector<1x128xf32> to vector<8x128xf32>
    %64 = arith.addf %63, %62 : vector<8x128xf32>
    %65 = arith.truncf %64 : vector<8x128xf32> to vector<8x128xbf16>
    %cst_29 = arith.constant dense<0.000000e+00> : vector<8x64xf32>
    %66 = tpu.matmul %65, %0, %cst_29 {dimension_numbers = #tpu.dot_dimension_numbers<[1], [0], [0], [1], [0, 0, 1, 1], [], []>} : vector<8x128xbf16>, vector<128x64xbf16>, vector<8x64xf32> -> vector<8x64xf32>
    %67 = vector.broadcast %1 : vector<1x64xf32> to vector<8x64xf32>
    %68 = arith.addf %66, %67 : vector<8x64xf32>
    %c1_30 = arith.constant 1 : index
    %c0_31 = arith.constant 0 : index
    %c0_32 = arith.constant 0 : index
    %69 = vector.load %arg5[%c1_30, %c0_31, %c0_32] : memref<2x8x64xf32, #tpu.memory_space<vmem>>, vector<1x8x64xf32>
    %70 = vector.shape_cast %69 : vector<1x8x64xf32> to vector<8x64xf32>
    %71 = vector.shape_cast %68 : vector<8x64xf32> to vector<1x8x64xf32>
    tpu.vector_store %arg5[%c1_30, %c0_31, %c0_32], %71 {strides = array<i32>} : memref<2x8x64xf32, #tpu.memory_space<vmem>>, vector<1x8x64xf32>,
    return
  }
  func.func @transform_0(%arg0: i32) -> (i32, i32, i32) {
    %c0_i32 = arith.constant 0 : i32
    %c0_i32_0 = arith.constant 0 : i32
    %c0_i32_1 = arith.constant 0 : i32
    %c0_i32_2 = arith.constant 0 : i32
    return %c0_i32, %c0_i32_0, %c0_i32_1 : i32, i32, i32
  }
  func.func @transform_1(%arg0: i32) -> (i32, i32, i32) {
    %c0_i32 = arith.constant 0 : i32
    %c0_i32_0 = arith.constant 0 : i32
    %c0_i32_1 = arith.constant 0 : i32
    return %c0_i32, %arg0, %c0_i32_0 : i32, i32, i32
  }
  func.func @transform_2(%arg0: i32) -> (i32, i32) {
    %c0_i32 = arith.constant 0 : i32
    %c0_i32_0 = arith.constant 0 : i32
    %c0_i32_1 = arith.constant 0 : i32
    return %c0_i32, %c0_i32_0 : i32, i32
  }
  func.func @transform_3(%arg0: i32) -> (i32, i32) {
    %c0_i32 = arith.constant 0 : i32
    %c0_i32_0 = arith.constant 0 : i32
    %c0_i32_1 = arith.constant 0 : i32
    return %c0_i32, %c0_i32_0 : i32, i32
  }
  func.func @transform_4(%arg0: i32) -> (i32, i32, i32) {
    %c0_i32 = arith.constant 0 : i32
    %c0_i32_0 = arith.constant 0 : i32
    %c0_i32_1 = arith.constant 0 : i32
    return %c0_i32, %arg0, %c0_i32_0 : i32, i32, i32
  }
}

</mosaic_0001>

<bundles_post_ra>
// kernel: last_layer.1
= control target key start
LH: loop header
LB: loop body
LE: loop exit
PB: predicated region body
PF: predicated region fallthrough
CT: control target
= control target key end

     0   :  { %s432_s0 = inlined_call_operand.vmem [shape: f32[2,2,128], index: 0, kind: input, shape index: {}]   ;;  %s433_s1 = inlined_call_operand.vmem [shape: f32[2,8,128], index: 1, kind: input, shape index: {}]   ;;  %s434_s2 = inlined_call_operand.vmem [shape: bf16[128,64], index: 2, kind: input, shape index: {}]   ;;  %s435_s3 = inlined_call_operand.vmem [shape: f32[1,64], index: 3, kind: input, shape index: {}]   ;;  %s436_s4 = inlined_call_operand.hbm [shape: f32[2,8,64], index: 4, kind: output, shape index: {}]  }
   0x1   :  { %v39_v0 = vld [vmem:[%s433_s1] sm:$0xff]  ;;  %v251_v1 = vld [vmem:[%s433_s1 + $0x8] sm:$0xff] }
   0x2   :  { %40 = vadd.xlane.f32.xlu0 %v39_v0 }
   0x6   :  { %161 = vadd.xlane.f32.xlu0 %v251_v1 }
   0x7   :  { %9 = vsyncpa [#allocation3], 0  ;;  %v315_v2 = vld [vmem:[%s434_s2] sm:$0xff]   ;;  %v351_v3 = vmov 0.0   ;;  %v316_v4 = vld [vmem:[%s434_s2 + $0x8] sm:$0xff]   ;;  %vm352_vm0 = vmmov 0   ;;  %v52_v21 = vlaneseq }
   0x8   :  { %270 = vmatprep.subr.bf16.mxu0 %v351_v3  ;;  %290 = vmatprep.subr.bf16.mxu1 %v351_v3  ;;  %v317_v13 = vld [vmem:[%s434_s2 + $0x10] sm:$0xff]   ;;  %v318_v14 = vld [vmem:[%s434_s2 + $0x18] sm:$0xff]   ;;  %v319_v15 = vld [vmem:[%s434_s2 + $0x20] sm:$0xff]   ;;  %vm157_vm1 = vcmask 523264  }
   0x9   :  { %271 = vmatpush3.bf16.msra.mxu0 %v315_v2  ;;  %291 = vmatpush3.bf16.msra.mxu1 %v315_v2  ;;  %v320_v16 = vld [vmem:[%s434_s2 + $0x28] sm:$0xff]   ;;  %v321_v17 = vld [vmem:[%s434_s2 + $0x30] sm:$0xff]   ;;  %v322_v18 = vld [vmem:[%s434_s2 + $0x38] sm:$0xff]   ;;  %v53_v25 = vshrl.u32 %v52_v21, 7 }
   0xa   :  { %272 = vmatprep.subr.bf16.mxu0 %v351_v3  ;;  %292 = vmatprep.subr.bf16.mxu1 %v351_v3  ;;  %v241_v27 = vld [vmem:[%s432_s0 + $0x2] sm:$0x3]  ;;  %v36_v30 = vld [vmem:[%s432_s0] sm:$0x3]  ;;  %s353_s0 = smov [#allocation2]  }
   0xb   :  { %286 = vmatprep.mubr.msk.bf16.mxu0 %vm352_vm0, %v351_v3  ;;  %306 = vmatprep.mubr.msk.bf16.mxu1 %vm352_vm0, %v351_v3  ;;  %v51_v28 = vadd.f32 1.0, %v241_v27  ;;  %v54_v29 = vsub.s32 0, %v53_v25  ;;  %v174_v32 = vsub.s32 1, %v53_v25  ;;  %v242_v46 = vld [vmem:[%s435_s3] ss:$0 sm:$0xff]  ;;  %s230_s13 = sshll.u32 %s353_s0, 4  ;;  %s231_s13 = int_to_ptr.vmem [resolvable:$true] %s230_s13 }
   0xc   :  { %s327_s14 = scalar_lea.vmem %s231_s13, 256  ;;  %p332_p1 = scmp.lt.s32.totalorder %s231_s13, %s231_s13 }
   0xd   :  { %273 = vmatpush3.bf16.msra.mxu0 %v316_v4  ;;  %293 = vmatpush3.bf16.msra.mxu1 %v316_v4  ;;  %v55_v31 = vrot.slane %v51_v28, %v54_v29  ;;  %v60_v35 = vrot.slane %v36_v30, %v54_v29  ;;  %v175_v37 = vrot.slane %v51_v28, %v174_v32  ;;  %p328_p0 = scmp.ne.s32.totalorder %s231_s13, %s327_s14  ;;  %p333_p2 = scmp.lt.s32.totalorder %s327_s14, %s327_s14 }
   0xe   :  { %274 = vmatprep.subr.bf16.mxu0 %v351_v3  ;;  %294 = vmatprep.subr.bf16.mxu1 %v351_v3  ;;  %v180_v41 = vrot.slane %v36_v30, %v174_v32 }
   0xf   :  { %p334_p3 = por %p333_p2, %p332_p1 }
  0x11   :  { %275 = vmatpush3.bf16.msra.mxu0 %v317_v13  ;;  %295 = vmatpush3.bf16.msra.mxu1 %v317_v13  ;;  %p335_p4 = pnand %p334_p3, %p328_p0 }
  0x12   :  { %276 = vmatprep.subr.bf16.mxu0 %v351_v3  ;;  %296 = vmatprep.subr.bf16.mxu1 %v351_v3 }
  0x15   :  { %277 = vmatpush3.bf16.msra.mxu0 %v318_v14  ;;  %297 = vmatpush3.bf16.msra.mxu1 %v318_v14 }
  0x16   :  { %278 = vmatprep.subr.bf16.mxu0 %v351_v3  ;;  %298 = vmatprep.subr.bf16.mxu1 %v351_v3 }
  0x19   :  { %279 = vmatpush3.bf16.msra.mxu0 %v319_v15  ;;  %299 = vmatpush3.bf16.msra.mxu1 %v319_v15 }
  0x1a   :  { %280 = vmatprep.subr.bf16.mxu0 %v351_v3  ;;  %300 = vmatprep.subr.bf16.mxu1 %v351_v3 }
  0x1d   :  { %281 = vmatpush3.bf16.msra.mxu0 %v320_v16  ;;  %301 = vmatpush3.bf16.msra.mxu1 %v320_v16 }
  0x1e   :  { %282 = vmatprep.subr.bf16.mxu0 %v351_v3  ;;  %302 = vmatprep.subr.bf16.mxu1 %v351_v3 }
  0x21   :  { %283 = vmatpush3.bf16.msra.mxu0 %v321_v17  ;;  %303 = vmatpush3.bf16.msra.mxu1 %v321_v17 }
  0x22   :  { %284 = vmatprep.subr.bf16.mxu0 %v351_v3  ;;  %304 = vmatprep.subr.bf16.mxu1 %v351_v3 }
  0x25   :  { %285 = vmatpush3.bf16.msra.mxu0 %v322_v18  ;;  %305 = vmatpush3.bf16.msra.mxu1 %v322_v18 }
  0x8f   :  { %v41_v5 = vpop.xlane.xlu0 %40 }
  0x90   :  { %v42_v6 = vmul.f32 0.0078125, %v41_v5 }
  0x92   :  { %v43_v7 = vsub.f32 %v39_v0, %v42_v6 }
  0x93   :  { %v162_v8 = vpop.xlane.xlu0 %161 }
  0x94   :  { %v163_v9 = vmul.f32 0.0078125, %v162_v8  ;;  %v44_v10 = vmul.f32 %v43_v7, %v43_v7 }
  0x96   :  { %v164_v11 = vsub.f32 %v251_v1, %v163_v9  ;;  %45 = vadd.xlane.f32.xlu1 %v44_v10 }
  0x98   :  { %v165_v12 = vmul.f32 %v164_v11, %v164_v11 }
  0x9a   :  { %166 = vadd.xlane.f32.xlu1 %v165_v12 }
 0x123   :  { %v46_v19 = vpop.xlane.xlu1 %45 }
 0x124   :  { %v47_v20 = vmul.f32 0.0078125, %v46_v19 }
 0x126   :  { %v48_v22 = vadd.f32 1e-06, %v47_v20 }
 0x127   :  { %v167_v23 = vpop.xlane.xlu1 %166 }
 0x128   :  { %323 = vrsqrt.f32 %v48_v22  ;;  %v168_v24 = vmul.f32 0.0078125, %v167_v23 }
 0x12a   :  { %v169_v26 = vadd.f32 1e-06, %v168_v24 }
 0x12c   :  { %325 = vrsqrt.f32 %v169_v26 }
 0x132   :  { %v324_v33 = vpop.eup %323 }
 0x133   :  { %v50_v34 = vmul.f32 %v324_v33, %v43_v7 }
 0x135   :  { %v56_v36 = vmul.f32 %v55_v31, %v50_v34 }
 0x136   :  { %v326_v38 = vpop.eup %325 }
 0x137   :  { %v61_v39 = vadd.f32 %v60_v35, %v56_v36  ;;  %v171_v40 = vmul.f32 %v326_v38, %v164_v11 }
 0x139   :  { %v62_v42 = vpack.c.bf16 %v61_v39, %v61_v39  ;;  %v176_v43 = vmul.f32 %v175_v37, %v171_v40 }
 0x13b   :  { %287 = vmatmul.mubr.bf16.vlgmr.msra.gmra.mrb[0].mxu0 %v62_v42  ;;  %v181_v44 = vadd.f32 %v180_v41, %v176_v43 }
 0x13d   :  { %v182_v45 = vpack.c.bf16 %v181_v44, %v181_v44 }
 0x13f   :  { %307 = vmatmul.mubr.bf16.vlgmr.msra.gmra.mrb[0].mxu1 %v182_v45 }
 0x20e   :  { %v151_v47 = vpop.f32.mrb[0].mxu0 }
 0x20f   :  { %v152_v48 = vadd.f32 %v242_v46, %v151_v47  ;;  %v288_v49 = vpop.f32.mrb[1].mxu0 }
 0x210   :  { %v154_v50 = vpop.f32.mrb[2].mxu0 }
 0x211   :  { %158 = vst.msk [vmem:[#allocation2] sm:$0xff] %vm157_vm1, %v152_v48  ;;  %v289_v51 = vpop.f32.mrb[3].mxu0 }
 0x212   :  { %v217_v52 = vpop.f32.mrb[0].mxu1 }
 0x213   :  { %v218_v53 = vadd.f32 %v242_v46, %v217_v52  ;;  %v308_v54 = vpop.f32.mrb[1].mxu1 }
 0x214   :  { %v220_v55 = vpop.f32.mrb[2].mxu1 }
 0x215   :  { %224 = vst.msk [vmem:[#allocation2 + $0x8] sm:$0xff] %vm157_vm1, %v218_v53  ;;  %v309_v56 = vpop.f32.mrb[3].mxu1 }
 0x216   :  { %338 = shalt.err (!%p335_p4)
}
 0x217   :  { %s339_s16 = scalar_lea.hbm %s436_s4, 256 }
 0x218   :  { %p340_p5 = scmp.ne.s32.totalorder %s436_s4, %s339_s16  ;;  %p343_p6 = scmp.lt.u32.totalorder %s339_s16, %s436_s4 }
 0x21a   :  { %p345_p7 = pnand %p343_p6, %p340_p5 }
 0x21c   :  { %348 = shalt.err (!%p345_p7)
}
 0x21d   :  { %s354_s21 = smov 128   ;;  %s355_s22 = smov 8  }
 0x21e   :  { %236 = dma.vmem_to_hbm [thread:$0]  %s231_s13, 256, %s436_s4, [#allocation3], %s354_s21, %s354_s21, %s355_s22  }
 0x21f   :  { %349 = dma.done.wait [#allocation3], 256  }
 0x220   :  { %350 = vsyncadd [#allocation3], 4294967040 }
 0x221   :  { %240 = vsyncpa [#allocation3], 1 }

</bundles_post_ra>
